<compile_context>
chip_gen: v7x
topology: tpu7x:2x2x1
jax: 0.10.0
libtpu: 0.0.40
codegen_flags: <defaults>
</compile_context>

<pallas_src>
import math

import jax
import jax.numpy as jnp
from jax import lax
from jax.experimental import pallas as pl
from jax.experimental.pallas import tpu as pltpu

NUM_AGENTS = 7
HISTLEN = 40
FEATURE_DIM = 256
NUM_HEADS = 8
HEAD_DIM = FEATURE_DIM // NUM_HEADS
FFN_DIM = 512


# ----------------------------------------------------------------------------
# Fully fused Pallas kernel: concat -> ST1 -> ST2 -> ReLU
# ----------------------------------------------------------------------------
def _fusion_kernel(v2v_ref, v2m_ref, bias_ref,
                   wqkv1, bqkv1, wo1, bo1, w11, b11, w21, b21, g1, be1,
                   wqkv2, bqkv2, wo2, bo2, w12, b12, w22, b22, g2, be2,
                   o_ref):
    E, H, hd = FEATURE_DIM, NUM_HEADS, HEAD_DIM
    scale = 1.0 / math.sqrt(hd)

    # Input concat in-kernel: (BA, 128) ++ (BA, 128) -> (BA, 256), f32.
    x = jnp.concatenate([v2v_ref[...], v2m_ref[...]], axis=-1)
    bias = bias_ref[...]                           # (BA, BA) additive mask bias, f32

    def self_transformer(x, wqkv, bqkv, wo, bo, w1, b1, w2, b2, g, be, final_relu):
        # ---- fused QKV projection: (BA, E) @ (E, 3E), bf16 MXU, f32 accumulate ----
        qkv = jnp.dot(x.astype(jnp.bfloat16), wqkv[...],
                      preferred_element_type=jnp.float32) + bqkv[...]   # (BA, 3E) f32

        # ---- attention: all heads, both batches at once (block-diagonal bias) ----
        ctx_heads = []
        for h in range(H):                         # static loop, heads = lane slices
            q_h = qkv[:, h * hd:(h + 1) * hd].astype(jnp.bfloat16)          # (BA, hd)
            k_h = qkv[:, E + h * hd:E + (h + 1) * hd].astype(jnp.bfloat16)  # (BA, hd)
            v_h = qkv[:, 2 * E + h * hd:2 * E + (h + 1) * hd].astype(jnp.bfloat16)
            s = lax.dot_general(q_h, k_h, (((1,), (1,)), ((), ())),
                                preferred_element_type=jnp.float32)         # (BA, BA)
            s = s * scale + bias
            s = s - jnp.max(s, axis=-1, keepdims=True)
            p = jnp.exp(s)
            p = p * pl.reciprocal(jnp.sum(p, axis=-1, keepdims=True), approx=True)
            ctx_heads.append(jnp.dot(p.astype(jnp.bfloat16), v_h,
                                     preferred_element_type=jnp.float32))   # (BA, hd)
        ctx = jnp.concatenate(ctx_heads, axis=-1)                           # (BA, E)

        # ---- single lane-dense output projection (no per-head Wo, no head-sum) ----
        attn = jnp.dot(ctx.astype(jnp.bfloat16), wo[...],
                       preferred_element_type=jnp.float32) + bo[...]        # (BA, E)

        # ---- FFN1 + ReLU + FFN2 + residual(block input) + LayerNorm ----
        h1 = jnp.dot(attn.astype(jnp.bfloat16), w1[...],
                     preferred_element_type=jnp.float32) + b1[...]          # (BA, 512)
        h1 = jnp.maximum(h1, 0.0)
        y = jnp.dot(h1.astype(jnp.bfloat16), w2[...],
                    preferred_element_type=jnp.float32) + b2[...]           # (BA, E)
        y = y + x                                          # residual in f32
        mu = jnp.mean(y, axis=-1, keepdims=True)
        yc = y - mu
        var = jnp.mean(yc * yc, axis=-1, keepdims=True)
        out = yc * lax.rsqrt(var + 1e-5) * g[...] + be[...]
        if final_relu:
            out = jnp.maximum(out, 0.0)
        return out

    x1 = self_transformer(x, wqkv1, bqkv1, wo1, bo1, w11, b11, w21, b21, g1, be1,
                          final_relu=False)
    x2 = self_transformer(x1, wqkv2, bqkv2, wo2, bo2, w12, b12, w22, b22, g2, be2,
                          final_relu=True)                 # trailing nn.ReLU() fused
    o_ref[...] = x2


# ----------------------------------------------------------------------------
# Wrapper
# ----------------------------------------------------------------------------
def fusion_forward(params, agents, v2v_feature, v2m_feature):
    B, A = v2v_feature.shape[:2]
    BA = B * A

    # Tiny XLA-side prep: key-padding + cross-batch block-diagonal bias (BA, BA).
    key_pad = (agents[:, :, 0, 0] == 0).reshape(BA)                    # (BA,)
    batch_id = jnp.repeat(jnp.arange(B, dtype=jnp.int32), A)           # (BA,)
    cross = batch_id[:, None] != batch_id[None, :]
    bias = jnp.where(cross | key_pad[None, :], -1e9, 0.0).astype(jnp.float32)

    v2v = v2v_feature.reshape(BA, v2v_feature.shape[-1])
    v2m = v2m_feature.reshape(BA, v2m_feature.shape[-1])
    p1, p2 = params["it1"], params["it2"]

    out = pl.pallas_call(
        _fusion_kernel,
        out_shape=jax.ShapeDtypeStruct((BA, FEATURE_DIM), jnp.float32),
    )(v2v, v2m, bias,
      p1["wqkv"], p1["bqkv"], p1["wo"], p1["bo"],
      p1["w1"], p1["b1"], p1["w2"], p1["b2"], p1["ln_g"], p1["ln_b"],
      p2["wqkv"], p2["bqkv"], p2["wo"], p2["bo"],
      p2["w1"], p2["b1"], p2["w2"], p2["b2"], p2["ln_g"], p2["ln_b"])
    return out.reshape(B, A, FEATURE_DIM)


# ----------------------------------------------------------------------------
# Deterministic synthetic parameters (weights stored (in, out) = torch W.T)
# ----------------------------------------------------------------------------
def _dense(key, din, dout, scale=0.02):
    kw, kb = jax.random.split(key)
    w = scale * jax.random.normal(kw, (din, dout), jnp.float32)
    b = scale * jax.random.normal(kb, (dout,), jnp.float32)
    return w, b


def init_self_transformer(key, dim=FEATURE_DIM):
    kq, kk, kv, ko, k1, k2 = jax.random.split(key, 6)
    wq, bq = _dense(kq, dim, dim)
    wk, bk = _dense(kk, dim, dim)
    wv, bv = _dense(kv, dim, dim)
    wo, bo = _dense(ko, dim, dim)
    w1, b1 = _dense(k1, dim, FFN_DIM)
    w2, b2 = _dense(k2, FFN_DIM, dim)
    return {
        # MXU weights stored bf16 (f32 accumulation in-kernel); biases / LN stay f32.
        "wqkv": jnp.concatenate([wq, wk, wv], axis=1).astype(jnp.bfloat16),  # (E, 3E)
        "bqkv": jnp.concatenate([bq, bk, bv]).reshape(1, 3 * dim),
        "wo": wo.astype(jnp.bfloat16),                                       # (E, E)
        "bo": bo.reshape(1, dim),
        "w1": w1.astype(jnp.bfloat16),                                       # (E, 512)
        "b1": b1.reshape(1, FFN_DIM),
        "w2": w2.astype(jnp.bfloat16),                                       # (512, E)
        "b2": b2.reshape(1, dim),
        "ln_g": jnp.ones((1, dim), jnp.float32),
        "ln_b": jnp.zeros((1, dim), jnp.float32),
    }


def init_params(key):
    k1, k2 = jax.random.split(key)
    return {"it1": init_self_transformer(k1), "it2": init_self_transformer(k2)}


# ----------------------------------------------------------------------------
if __name__ == "__main__":
    key = jax.random.PRNGKey(0)
    kp, ka, kv2v, kv2m = jax.random.split(key, 4)
    params = init_params(kp)

    B = 2
    agents = jax.random.normal(ka, (B, NUM_AGENTS, HISTLEN, 7), jnp.float32)
    # Mark the last agent of each batch as padded to exercise the key-padding mask.
    agents = agents.at[:, -1, 0, 0].set(0.0)
    v2v = jax.random.normal(kv2v, (B, NUM_AGENTS, 128), jnp.float32)
    v2m = jax.random.normal(kv2m, (B, NUM_AGENTS, 128), jnp.float32)

    fwd = jax.jit(fusion_forward)
    out = jax.block_until_ready(fwd(params, agents, v2v, v2m))

    assert out.shape == (B, NUM_AGENTS, FEATURE_DIM)
    assert bool(jnp.all(jnp.isfinite(out)))
    assert bool(jnp.all(out >= 0.0))   # final nn.ReLU
    print("KERNEL_OK")
</pallas_src>

<mosaic_0001>
module attributes {stable_mosaic.version = 11 : i64} {
  func.func @_fusion_kernel(%arg0: memref<14x128xf32, #tpu.memory_space<vmem>>, %arg1: memref<14x128xf32, #tpu.memory_space<vmem>>, %arg2: memref<14x14xf32, #tpu.memory_space<vmem>>, %arg3: memref<256x768xbf16, #tpu.memory_space<vmem>>, %arg4: memref<1x768xf32, #tpu.memory_space<vmem>>, %arg5: memref<256x256xbf16, #tpu.memory_space<vmem>>, %arg6: memref<1x256xf32, #tpu.memory_space<vmem>>, %arg7: memref<256x512xbf16, #tpu.memory_space<vmem>>, %arg8: memref<1x512xf32, #tpu.memory_space<vmem>>, %arg9: memref<512x256xbf16, #tpu.memory_space<vmem>>, %arg10: memref<1x256xf32, #tpu.memory_space<vmem>>, %arg11: memref<1x256xf32, #tpu.memory_space<vmem>>, %arg12: memref<1x256xf32, #tpu.memory_space<vmem>>, %arg13: memref<256x768xbf16, #tpu.memory_space<vmem>>, %arg14: memref<1x768xf32, #tpu.memory_space<vmem>>, %arg15: memref<256x256xbf16, #tpu.memory_space<vmem>>, %arg16: memref<1x256xf32, #tpu.memory_space<vmem>>, %arg17: memref<256x512xbf16, #tpu.memory_space<vmem>>, %arg18: memref<1x512xf32, #tpu.memory_space<vmem>>, %arg19: memref<512x256xbf16, #tpu.memory_space<vmem>>, %arg20: memref<1x256xf32, #tpu.memory_space<vmem>>, %arg21: memref<1x256xf32, #tpu.memory_space<vmem>>, %arg22: memref<1x256xf32, #tpu.memory_space<vmem>>, %arg23: memref<14x256xf32, #tpu.memory_space<vmem>>) attributes {dimension_semantics = [], scalar_prefetch = 0 : i64, scratch_operands = 0 : i64, tpu.core_type = #tpu.core_type<tc>} {
    %c0 = arith.constant 0 : index
    %c0_0 = arith.constant 0 : index
    %0 = vector.load %arg0[%c0, %c0_0] : memref<14x128xf32, #tpu.memory_space<vmem>>, vector<14x128xf32>
    %c0_1 = arith.constant 0 : index
    %c0_2 = arith.constant 0 : index
    %1 = vector.load %arg1[%c0_1, %c0_2] : memref<14x128xf32, #tpu.memory_space<vmem>>, vector<14x128xf32>
    %2 = tpu.concatenate %0, %1 in 1 : vector<14x128xf32>, vector<14x128xf32> -> vector<14x256xf32>
    %c0_3 = arith.constant 0 : index
    %c0_4 = arith.constant 0 : index
    %3 = vector.load %arg2[%c0_3, %c0_4] : memref<14x14xf32, #tpu.memory_space<vmem>>, vector<14x14xf32>
    %4 = arith.truncf %2 : vector<14x256xf32> to vector<14x256xbf16>
    %c0_5 = arith.constant 0 : index
    %c0_6 = arith.constant 0 : index
    %5 = vector.load %arg3[%c0_5, %c0_6] : memref<256x768xbf16, #tpu.memory_space<vmem>>, vector<256x768xbf16>
    %cst = arith.constant dense<0.000000e+00> : vector<14x768xf32>
    %6 = tpu.matmul %4, %5, %cst {dimension_numbers = #tpu.dot_dimension_numbers<[1], [0], [0], [1], [0, 0, 1, 1], [], []>} : vector<14x256xbf16>, vector<256x768xbf16>, vector<14x768xf32> -> vector<14x768xf32>
    %c0_7 = arith.constant 0 : index
    %c0_8 = arith.constant 0 : index
    %7 = vector.load %arg4[%c0_7, %c0_8] : memref<1x768xf32, #tpu.memory_space<vmem>>, vector<1x768xf32>
    %8 = vector.broadcast %7 : vector<1x768xf32> to vector<14x768xf32>
    %9 = arith.addf %6, %8 : vector<14x768xf32>
    %10 = vector.extract_strided_slice %9 {offsets = [0, 0], sizes = [14, 32], strides = [1, 1]} : vector<14x768xf32> to vector<14x32xf32>
    %11 = arith.truncf %10 : vector<14x32xf32> to vector<14x32xbf16>
    %12 = vector.extract_strided_slice %9 {offsets = [0, 256], sizes = [14, 32], strides = [1, 1]} : vector<14x768xf32> to vector<14x32xf32>
    %13 = arith.truncf %12 : vector<14x32xf32> to vector<14x32xbf16>
    %14 = vector.extract_strided_slice %9 {offsets = [0, 512], sizes = [14, 32], strides = [1, 1]} : vector<14x768xf32> to vector<14x32xf32>
    %15 = arith.truncf %14 : vector<14x32xf32> to vector<14x32xbf16>
    %cst_9 = arith.constant dense<0.000000e+00> : vector<14x14xf32>
    %16 = tpu.matmul %11, %13, %cst_9 {dimension_numbers = #tpu.dot_dimension_numbers<[1], [1], [0], [0], [0, 0, 1, 0], [], []>} : vector<14x32xbf16>, vector<14x32xbf16>, vector<14x14xf32> -> vector<14x14xf32>
    %cst_10 = arith.constant 0.176776692 : f32
    %17 = vector.broadcast %cst_10 : f32 to vector<14x14xf32>
    %18 = arith.mulf %16, %17 : vector<14x14xf32>
    %19 = arith.addf %18, %3 : vector<14x14xf32>
    %cst_11 = arith.constant dense<0xFF800000> : vector<14xf32>
    %20 = vector.multi_reduction <maximumf>, %19, %cst_11 [1] : vector<14x14xf32> to vector<14xf32>
    %21 = vector.shape_cast %20 : vector<14xf32> to vector<14x1xf32>
    %22 = vector.broadcast %21 : vector<14x1xf32> to vector<14x14xf32>
    %23 = arith.subf %19, %22 : vector<14x14xf32>
    %24 = math.exp %23 : vector<14x14xf32>
    %cst_12 = arith.constant dense<0.000000e+00> : vector<14xf32>
    %25 = vector.multi_reduction <add>, %24, %cst_12 [1] : vector<14x14xf32> to vector<14xf32>
    %26 = vector.shape_cast %25 : vector<14xf32> to vector<14x1xf32>
    %27 = tpu.reciprocal %26 {approx = true} : vector<14x1xf32> -> vector<14x1xf32>
    %28 = vector.broadcast %27 : vector<14x1xf32> to vector<14x14xf32>
    %29 = arith.mulf %24, %28 : vector<14x14xf32>
    %30 = arith.truncf %29 : vector<14x14xf32> to vector<14x14xbf16>
    %cst_13 = arith.constant dense<0.000000e+00> : vector<14x32xf32>
    %31 = tpu.matmul %30, %15, %cst_13 {dimension_numbers = #tpu.dot_dimension_numbers<[1], [0], [0], [1], [0, 0, 1, 1], [], []>} : vector<14x14xbf16>, vector<14x32xbf16>, vector<14x32xf32> -> vector<14x32xf32>
    %32 = vector.extract_strided_slice %9 {offsets = [0, 32], sizes = [14, 32], strides = [1, 1]} : vector<14x768xf32> to vector<14x32xf32>
    %33 = arith.truncf %32 : vector<14x32xf32> to vector<14x32xbf16>
    %34 = vector.extract_strided_slice %9 {offsets = [0, 288], sizes = [14, 32], strides = [1, 1]} : vector<14x768xf32> to vector<14x32xf32>
    %35 = arith.truncf %34 : vector<14x32xf32> to vector<14x32xbf16>
    %36 = vector.extract_strided_slice %9 {offsets = [0, 544], sizes = [14, 32], strides = [1, 1]} : vector<14x768xf32> to vector<14x32xf32>
    %37 = arith.truncf %36 : vector<14x32xf32> to vector<14x32xbf16>
    %cst_14 = arith.constant dense<0.000000e+00> : vector<14x14xf32>
    %38 = tpu.matmul %33, %35, %cst_14 {dimension_numbers = #tpu.dot_dimension_numbers<[1], [1], [0], [0], [0, 0, 1, 0], [], []>} : vector<14x32xbf16>, vector<14x32xbf16>, vector<14x14xf32> -> vector<14x14xf32>
    %cst_15 = arith.constant 0.176776692 : f32
    %39 = vector.broadcast %cst_15 : f32 to vector<14x14xf32>
    %40 = arith.mulf %38, %39 : vector<14x14xf32>
    %41 = arith.addf %40, %3 : vector<14x14xf32>
    %cst_16 = arith.constant dense<0xFF800000> : vector<14xf32>
    %42 = vector.multi_reduction <maximumf>, %41, %cst_16 [1] : vector<14x14xf32> to vector<14xf32>
    %43 = vector.shape_cast %42 : vector<14xf32> to vector<14x1xf32>
    %44 = vector.broadcast %43 : vector<14x1xf32> to vector<14x14xf32>
    %45 = arith.subf %41, %44 : vector<14x14xf32>
    %46 = math.exp %45 : vector<14x14xf32>
    %cst_17 = arith.constant dense<0.000000e+00> : vector<14xf32>
    %47 = vector.multi_reduction <add>, %46, %cst_17 [1] : vector<14x14xf32> to vector<14xf32>
    %48 = vector.shape_cast %47 : vector<14xf32> to vector<14x1xf32>
    %49 = tpu.reciprocal %48 {approx = true} : vector<14x1xf32> -> vector<14x1xf32>
    %50 = vector.broadcast %49 : vector<14x1xf32> to vector<14x14xf32>
    %51 = arith.mulf %46, %50 : vector<14x14xf32>
    %52 = arith.truncf %51 : vector<14x14xf32> to vector<14x14xbf16>
    %cst_18 = arith.constant dense<0.000000e+00> : vector<14x32xf32>
    %53 = tpu.matmul %52, %37, %cst_18 {dimension_numbers = #tpu.dot_dimension_numbers<[1], [0], [0], [1], [0, 0, 1, 1], [], []>} : vector<14x14xbf16>, vector<14x32xbf16>, vector<14x32xf32> -> vector<14x32xf32>
    %54 = vector.extract_strided_slice %9 {offsets = [0, 64], sizes = [14, 32], strides = [1, 1]} : vector<14x768xf32> to vector<14x32xf32>
    %55 = arith.truncf %54 : vector<14x32xf32> to vector<14x32xbf16>
    %56 = vector.extract_strided_slice %9 {offsets = [0, 320], sizes = [14, 32], strides = [1, 1]} : vector<14x768xf32> to vector<14x32xf32>
    %57 = arith.truncf %56 : vector<14x32xf32> to vector<14x32xbf16>
    %58 = vector.extract_strided_slice %9 {offsets = [0, 576], sizes = [14, 32], strides = [1, 1]} : vector<14x768xf32> to vector<14x32xf32>
    %59 = arith.truncf %58 : vector<14x32xf32> to vector<14x32xbf16>
    %cst_19 = arith.constant dense<0.000000e+00> : vector<14x14xf32>
    %60 = tpu.matmul %55, %57, %cst_19 {dimension_numbers = #tpu.dot_dimension_numbers<[1], [1], [0], [0], [0, 0, 1, 0], [], []>} : vector<14x32xbf16>, vector<14x32xbf16>, vector<14x14xf32> -> vector<14x14xf32>
    %cst_20 = arith.constant 0.176776692 : f32
    %61 = vector.broadcast %cst_20 : f32 to vector<14x14xf32>
    %62 = arith.mulf %60, %61 : vector<14x14xf32>
    %63 = arith.addf %62, %3 : vector<14x14xf32>
    %cst_21 = arith.constant dense<0xFF800000> : vector<14xf32>
    %64 = vector.multi_reduction <maximumf>, %63, %cst_21 [1] : vector<14x14xf32> to vector<14xf32>
    %65 = vector.shape_cast %64 : vector<14xf32> to vector<14x1xf32>
    %66 = vector.broadcast %65 : vector<14x1xf32> to vector<14x14xf32>
    %67 = arith.subf %63, %66 : vector<14x14xf32>
    %68 = math.exp %67 : vector<14x14xf32>
    %cst_22 = arith.constant dense<0.000000e+00> : vector<14xf32>
    %69 = vector.multi_reduction <add>, %68, %cst_22 [1] : vector<14x14xf32> to vector<14xf32>
    %70 = vector.shape_cast %69 : vector<14xf32> to vector<14x1xf32>
    %71 = tpu.reciprocal %70 {approx = true} : vector<14x1xf32> -> vector<14x1xf32>
    %72 = vector.broadcast %71 : vector<14x1xf32> to vector<14x14xf32>
    %73 = arith.mulf %68, %72 : vector<14x14xf32>
    %74 = arith.truncf %73 : vector<14x14xf32> to vector<14x14xbf16>
    %cst_23 = arith.constant dense<0.000000e+00> : vector<14x32xf32>
    %75 = tpu.matmul %74, %59, %cst_23 {dimension_numbers = #tpu.dot_dimension_numbers<[1], [0], [0], [1], [0, 0, 1, 1], [], []>} : vector<14x14xbf16>, vector<14x32xbf16>, vector<14x32xf32> -> vector<14x32xf32>
    %76 = vector.extract_strided_slice %9 {offsets = [0, 96], sizes = [14, 32], strides = [1, 1]} : vector<14x768xf32> to vector<14x32xf32>
    %77 = arith.truncf %76 : vector<14x32xf32> to vector<14x32xbf16>
    %78 = vector.extract_strided_slice %9 {offsets = [0, 352], sizes = [14, 32], strides = [1, 1]} : vector<14x768xf32> to vector<14x32xf32>
    %79 = arith.truncf %78 : vector<14x32xf32> to vector<14x32xbf16>
    %80 = vector.extract_strided_slice %9 {offsets = [0, 608], sizes = [14, 32], strides = [1, 1]} : vector<14x768xf32> to vector<14x32xf32>
    %81 = arith.truncf %80 : vector<14x32xf32> to vector<14x32xbf16>
    %cst_24 = arith.constant dense<0.000000e+00> : vector<14x14xf32>
    %82 = tpu.matmul %77, %79, %cst_24 {dimension_numbers = #tpu.dot_dimension_numbers<[1], [1], [0], [0], [0, 0, 1, 0], [], []>} : vector<14x32xbf16>, vector<14x32xbf16>, vector<14x14xf32> -> vector<14x14xf32>
    %cst_25 = arith.constant 0.176776692 : f32
    %83 = vector.broadcast %cst_25 : f32 to vector<14x14xf32>
    %84 = arith.mulf %82, %83 : vector<14x14xf32>
    %85 = arith.addf %84, %3 : vector<14x14xf32>
    %cst_26 = arith.constant dense<0xFF800000> : vector<14xf32>
    %86 = vector.multi_reduction <maximumf>, %85, %cst_26 [1] : vector<14x14xf32> to vector<14xf32>
    %87 = vector.shape_cast %86 : vector<14xf32> to vector<14x1xf32>
    %88 = vector.broadcast %87 : vector<14x1xf32> to vector<14x14xf32>
    %89 = arith.subf %85, %88 : vector<14x14xf32>
    %90 = math.exp %89 : vector<14x14xf32>
    %cst_27 = arith.constant dense<0.000000e+00> : vector<14xf32>
    %91 = vector.multi_reduction <add>, %90, %cst_27 [1] : vector<14x14xf32> to vector<14xf32>
    %92 = vector.shape_cast %91 : vector<14xf32> to vector<14x1xf32>
    %93 = tpu.reciprocal %92 {approx = true} : vector<14x1xf32> -> vector<14x1xf32>
    %94 = vector.broadcast %93 : vector<14x1xf32> to vector<14x14xf32>
    %95 = arith.mulf %90, %94 : vector<14x14xf32>
    %96 = arith.truncf %95 : vector<14x14xf32> to vector<14x14xbf16>
    %cst_28 = arith.constant dense<0.000000e+00> : vector<14x32xf32>
    %97 = tpu.matmul %96, %81, %cst_28 {dimension_numbers = #tpu.dot_dimension_numbers<[1], [0], [0], [1], [0, 0, 1, 1], [], []>} : vector<14x14xbf16>, vector<14x32xbf16>, vector<14x32xf32> -> vector<14x32xf32>
    %98 = vector.extract_strided_slice %9 {offsets = [0, 128], sizes = [14, 32], strides = [1, 1]} : vector<14x768xf32> to vector<14x32xf32>
    %99 = arith.truncf %98 : vector<14x32xf32> to vector<14x32xbf16>
    %100 = vector.extract_strided_slice %9 {offsets = [0, 384], sizes = [14, 32], strides = [1, 1]} : vector<14x768xf32> to vector<14x32xf32>
    %101 = arith.truncf %100 : vector<14x32xf32> to vector<14x32xbf16>
    %102 = vector.extract_strided_slice %9 {offsets = [0, 640], sizes = [14, 32], strides = [1, 1]} : vector<14x768xf32> to vector<14x32xf32>
    %103 = arith.truncf %102 : vector<14x32xf32> to vector<14x32xbf16>
    %cst_29 = arith.constant dense<0.000000e+00> : vector<14x14xf32>
    %104 = tpu.matmul %99, %101, %cst_29 {dimension_numbers = #tpu.dot_dimension_numbers<[1], [1], [0], [0], [0, 0, 1, 0], [], []>} : vector<14x32xbf16>, vector<14x32xbf16>, vector<14x14xf32> -> vector<14x14xf32>
    %cst_30 = arith.constant 0.176776692 : f32
    %105 = vector.broadcast %cst_30 : f32 to vector<14x14xf32>
    %106 = arith.mulf %104, %105 : vector<14x14xf32>
    %107 = arith.addf %106, %3 : vector<14x14xf32>
    %cst_31 = arith.constant dense<0xFF800000> : vector<14xf32>
    %108 = vector.multi_reduction <maximumf>, %107, %cst_31 [1] : vector<14x14xf32> to vector<14xf32>
    %109 = vector.shape_cast %108 : vector<14xf32> to vector<14x1xf32>
    %110 = vector.broadcast %109 : vector<14x1xf32> to vector<14x14xf32>
    %111 = arith.subf %107, %110 : vector<14x14xf32>
    %112 = math.exp %111 : vector<14x14xf32>
    %cst_32 = arith.constant dense<0.000000e+00> : vector<14xf32>
    %113 = vector.multi_reduction <add>, %112, %cst_32 [1] : vector<14x14xf32> to vector<14xf32>
    %114 = vector.shape_cast %113 : vector<14xf32> to vector<14x1xf32>
    %115 = tpu.reciprocal %114 {approx = true} : vector<14x1xf32> -> vector<14x1xf32>
    %116 = vector.broadcast %115 : vector<14x1xf32> to vector<14x14xf32>
    %117 = arith.mulf %112, %116 : vector<14x14xf32>
    %118 = arith.truncf %117 : vector<14x14xf32> to vector<14x14xbf16>
    %cst_33 = arith.constant dense<0.000000e+00> : vector<14x32xf32>
    %119 = tpu.matmul %118, %103, %cst_33 {dimension_numbers = #tpu.dot_dimension_numbers<[1], [0], [0], [1], [0, 0, 1, 1], [], []>} : vector<14x14xbf16>, vector<14x32xbf16>, vector<14x32xf32> -> vector<14x32xf32>
    %120 = vector.extract_strided_slice %9 {offsets = [0, 160], sizes = [14, 32], strides = [1, 1]} : vector<14x768xf32> to vector<14x32xf32>
    %121 = arith.truncf %120 : vector<14x32xf32> to vector<14x32xbf16>
    %122 = vector.extract_strided_slice %9 {offsets = [0, 416], sizes = [14, 32], strides = [1, 1]} : vector<14x768xf32> to vector<14x32xf32>
    %123 = arith.truncf %122 : vector<14x32xf32> to vector<14x32xbf16>
    %124 = vector.extract_strided_slice %9 {offsets = [0, 672], sizes = [14, 32], strides = [1, 1]} : vector<14x768xf32> to vector<14x32xf32>
    %125 = arith.truncf %124 : vector<14x32xf32> to vector<14x32xbf16>
    %cst_34 = arith.constant dense<0.000000e+00> : vector<14x14xf32>
    %126 = tpu.matmul %121, %123, %cst_34 {dimension_numbers = #tpu.dot_dimension_numbers<[1], [1], [0], [0], [0, 0, 1, 0], [], []>} : vector<14x32xbf16>, vector<14x32xbf16>, vector<14x14xf32> -> vector<14x14xf32>
    %cst_35 = arith.constant 0.176776692 : f32
    %127 = vector.broadcast %cst_35 : f32 to vector<14x14xf32>
    %128 = arith.mulf %126, %127 : vector<14x14xf32>
    %129 = arith.addf %128, %3 : vector<14x14xf32>
    %cst_36 = arith.constant dense<0xFF800000> : vector<14xf32>
    %130 = vector.multi_reduction <maximumf>, %129, %cst_36 [1] : vector<14x14xf32> to vector<14xf32>
    %131 = vector.shape_cast %130 : vector<14xf32> to vector<14x1xf32>
    %132 = vector.broadcast %131 : vector<14x1xf32> to vector<14x14xf32>
    %133 = arith.subf %129, %132 : vector<14x14xf32>
    %134 = math.exp %133 : vector<14x14xf32>
    %cst_37 = arith.constant dense<0.000000e+00> : vector<14xf32>
    %135 = vector.multi_reduction <add>, %134, %cst_37 [1] : vector<14x14xf32> to vector<14xf32>
    %136 = vector.shape_cast %135 : vector<14xf32> to vector<14x1xf32>
    %137 = tpu.reciprocal %136 {approx = true} : vector<14x1xf32> -> vector<14x1xf32>
    %138 = vector.broadcast %137 : vector<14x1xf32> to vector<14x14xf32>
    %139 = arith.mulf %134, %138 : vector<14x14xf32>
    %140 = arith.truncf %139 : vector<14x14xf32> to vector<14x14xbf16>
    %cst_38 = arith.constant dense<0.000000e+00> : vector<14x32xf32>
    %141 = tpu.matmul %140, %125, %cst_38 {dimension_numbers = #tpu.dot_dimension_numbers<[1], [0], [0], [1], [0, 0, 1, 1], [], []>} : vector<14x14xbf16>, vector<14x32xbf16>, vector<14x32xf32> -> vector<14x32xf32>
    %142 = vector.extract_strided_slice %9 {offsets = [0, 192], sizes = [14, 32], strides = [1, 1]} : vector<14x768xf32> to vector<14x32xf32>
    %143 = arith.truncf %142 : vector<14x32xf32> to vector<14x32xbf16>
    %144 = vector.extract_strided_slice %9 {offsets = [0, 448], sizes = [14, 32], strides = [1, 1]} : vector<14x768xf32> to vector<14x32xf32>
    %145 = arith.truncf %144 : vector<14x32xf32> to vector<14x32xbf16>
    %146 = vector.extract_strided_slice %9 {offsets = [0, 704], sizes = [14, 32], strides = [1, 1]} : vector<14x768xf32> to vector<14x32xf32>
    %147 = arith.truncf %146 : vector<14x32xf32> to vector<14x32xbf16>
    %cst_39 = arith.constant dense<0.000000e+00> : vector<14x14xf32>
    %148 = tpu.matmul %143, %145, %cst_39 {dimension_numbers = #tpu.dot_dimension_numbers<[1], [1], [0], [0], [0, 0, 1, 0], [], []>} : vector<14x32xbf16>, vector<14x32xbf16>, vector<14x14xf32> -> vector<14x14xf32>
    %cst_40 = arith.constant 0.176776692 : f32
    %149 = vector.broadcast %cst_40 : f32 to vector<14x14xf32>
    %150 = arith.mulf %148, %149 : vector<14x14xf32>
    %151 = arith.addf %150, %3 : vector<14x14xf32>
    %cst_41 = arith.constant dense<0xFF800000> : vector<14xf32>
    %152 = vector.multi_reduction <maximumf>, %151, %cst_41 [1] : vector<14x14xf32> to vector<14xf32>
    %153 = vector.shape_cast %152 : vector<14xf32> to vector<14x1xf32>
    %154 = vector.broadcast %153 : vector<14x1xf32> to vector<14x14xf32>
    %155 = arith.subf %151, %154 : vector<14x14xf32>
    %156 = math.exp %155 : vector<14x14xf32>
    %cst_42 = arith.constant dense<0.000000e+00> : vector<14xf32>
    %157 = vector.multi_reduction <add>, %156, %cst_42 [1] : vector<14x14xf32> to vector<14xf32>
    %158 = vector.shape_cast %157 : vector<14xf32> to vector<14x1xf32>
    %159 = tpu.reciprocal %158 {approx = true} : vector<14x1xf32> -> vector<14x1xf32>
    %160 = vector.broadcast %159 : vector<14x1xf32> to vector<14x14xf32>
    %161 = arith.mulf %156, %160 : vector<14x14xf32>
    %162 = arith.truncf %161 : vector<14x14xf32> to vector<14x14xbf16>
    %cst_43 = arith.constant dense<0.000000e+00> : vector<14x32xf32>
    %163 = tpu.matmul %162, %147, %cst_43 {dimension_numbers = #tpu.dot_dimension_numbers<[1], [0], [0], [1], [0, 0, 1, 1], [], []>} : vector<14x14xbf16>, vector<14x32xbf16>, vector<14x32xf32> -> vector<14x32xf32>
    %164 = vector.extract_strided_slice %9 {offsets = [0, 224], sizes = [14, 32], strides = [1, 1]} : vector<14x768xf32> to vector<14x32xf32>
    %165 = arith.truncf %164 : vector<14x32xf32> to vector<14x32xbf16>
    %166 = vector.extract_strided_slice %9 {offsets = [0, 480], sizes = [14, 32], strides = [1, 1]} : vector<14x768xf32> to vector<14x32xf32>
    %167 = arith.truncf %166 : vector<14x32xf32> to vector<14x32xbf16>
    %168 = vector.extract_strided_slice %9 {offsets = [0, 736], sizes = [14, 32], strides = [1, 1]} : vector<14x768xf32> to vector<14x32xf32>
    %169 = arith.truncf %168 : vector<14x32xf32> to vector<14x32xbf16>
    %cst_44 = arith.constant dense<0.000000e+00> : vector<14x14xf32>
    %170 = tpu.matmul %165, %167, %cst_44 {dimension_numbers = #tpu.dot_dimension_numbers<[1], [1], [0], [0], [0, 0, 1, 0], [], []>} : vector<14x32xbf16>, vector<14x32xbf16>, vector<14x14xf32> -> vector<14x14xf32>
    %cst_45 = arith.constant 0.176776692 : f32
    %171 = vector.broadcast %cst_45 : f32 to vector<14x14xf32>
    %172 = arith.mulf %170, %171 : vector<14x14xf32>
    %173 = arith.addf %172, %3 : vector<14x14xf32>
    %cst_46 = arith.constant dense<0xFF800000> : vector<14xf32>
    %174 = vector.multi_reduction <maximumf>, %173, %cst_46 [1] : vector<14x14xf32> to vector<14xf32>
    %175 = vector.shape_cast %174 : vector<14xf32> to vector<14x1xf32>
    %176 = vector.broadcast %175 : vector<14x1xf32> to vector<14x14xf32>
    %177 = arith.subf %173, %176 : vector<14x14xf32>
    %178 = math.exp %177 : vector<14x14xf32>
    %cst_47 = arith.constant dense<0.000000e+00> : vector<14xf32>
    %179 = vector.multi_reduction <add>, %178, %cst_47 [1] : vector<14x14xf32> to vector<14xf32>
    %180 = vector.shape_cast %179 : vector<14xf32> to vector<14x1xf32>
    %181 = tpu.reciprocal %180 {approx = true} : vector<14x1xf32> -> vector<14x1xf32>
    %182 = vector.broadcast %181 : vector<14x1xf32> to vector<14x14xf32>
    %183 = arith.mulf %178, %182 : vector<14x14xf32>
    %184 = arith.truncf %183 : vector<14x14xf32> to vector<14x14xbf16>
    %cst_48 = arith.constant dense<0.000000e+00> : vector<14x32xf32>
    %185 = tpu.matmul %184, %169, %cst_48 {dimension_numbers = #tpu.dot_dimension_numbers<[1], [0], [0], [1], [0, 0, 1, 1], [], []>} : vector<14x14xbf16>, vector<14x32xbf16>, vector<14x32xf32> -> vector<14x32xf32>
    %186 = tpu.concatenate %31, %53, %75, %97, %119, %141, %163, %185 in 1 : vector<14x32xf32>, vector<14x32xf32>, vector<14x32xf32>, vector<14x32xf32>, vector<14x32xf32>, vector<14x32xf32>, vector<14x32xf32>, vector<14x32xf32> -> vector<14x256xf32>
    %187 = arith.truncf %186 : vector<14x256xf32> to vector<14x256xbf16>
    %c0_49 = arith.constant 0 : index
    %c0_50 = arith.constant 0 : index
    %188 = vector.load %arg5[%c0_49, %c0_50] : memref<256x256xbf16, #tpu.memory_space<vmem>>, vector<256x256xbf16>
    %cst_51 = arith.constant dense<0.000000e+00> : vector<14x256xf32>
    %189 = tpu.matmul %187, %188, %cst_51 {dimension_numbers = #tpu.dot_dimension_numbers<[1], [0], [0], [1], [0, 0, 1, 1], [], []>} : vector<14x256xbf16>, vector<256x256xbf16>, vector<14x256xf32> -> vector<14x256xf32>
    %c0_52 = arith.constant 0 : index
    %c0_53 = arith.constant 0 : index
    %190 = vector.load %arg6[%c0_52, %c0_53] : memref<1x256xf32, #tpu.memory_space<vmem>>, vector<1x256xf32>
    %191 = vector.broadcast %190 : vector<1x256xf32> to vector<14x256xf32>
    %192 = arith.addf %189, %191 : vector<14x256xf32>
    %193 = arith.truncf %192 : vector<14x256xf32> to vector<14x256xbf16>
    %c0_54 = arith.constant 0 : index
    %c0_55 = arith.constant 0 : index
    %194 = vector.load %arg7[%c0_54, %c0_55] : memref<256x512xbf16, #tpu.memory_space<vmem>>, vector<256x512xbf16>
    %cst_56 = arith.constant dense<0.000000e+00> : vector<14x512xf32>
    %195 = tpu.matmul %193, %194, %cst_56 {dimension_numbers = #tpu.dot_dimension_numbers<[1], [0], [0], [1], [0, 0, 1, 1], [], []>} : vector<14x256xbf16>, vector<256x512xbf16>, vector<14x512xf32> -> vector<14x512xf32>
    %c0_57 = arith.constant 0 : index
    %c0_58 = arith.constant 0 : index
    %196 = vector.load %arg8[%c0_57, %c0_58] : memref<1x512xf32, #tpu.memory_space<vmem>>, vector<1x512xf32>
    %197 = vector.broadcast %196 : vector<1x512xf32> to vector<14x512xf32>
    %198 = arith.addf %195, %197 : vector<14x512xf32>
    %cst_59 = arith.constant 0.000000e+00 : f32
    %199 = vector.broadcast %cst_59 : f32 to vector<14x512xf32>
    %200 = arith.maximumf %198, %199 : vector<14x512xf32>
    %201 = arith.truncf %200 : vector<14x512xf32> to vector<14x512xbf16>
    %c0_60 = arith.constant 0 : index
    %c0_61 = arith.constant 0 : index
    %202 = vector.load %arg9[%c0_60, %c0_61] : memref<512x256xbf16, #tpu.memory_space<vmem>>, vector<512x256xbf16>
    %cst_62 = arith.constant dense<0.000000e+00> : vector<14x256xf32>
    %203 = tpu.matmul %201, %202, %cst_62 {dimension_numbers = #tpu.dot_dimension_numbers<[1], [0], [0], [1], [0, 0, 1, 1], [], []>} : vector<14x512xbf16>, vector<512x256xbf16>, vector<14x256xf32> -> vector<14x256xf32>
    %c0_63 = arith.constant 0 : index
    %c0_64 = arith.constant 0 : index
    %204 = vector.load %arg10[%c0_63, %c0_64] : memref<1x256xf32, #tpu.memory_space<vmem>>, vector<1x256xf32>
    %205 = vector.broadcast %204 : vector<1x256xf32> to vector<14x256xf32>
    %206 = arith.addf %203, %205 : vector<14x256xf32>
    %207 = arith.addf %206, %2 : vector<14x256xf32>
    %cst_65 = arith.constant dense<0.000000e+00> : vector<14xf32>
    %208 = vector.multi_reduction <add>, %207, %cst_65 [1] : vector<14x256xf32> to vector<14xf32>
    %209 = vector.shape_cast %208 : vector<14xf32> to vector<14x1xf32>
    %cst_66 = arith.constant 2.560000e+02 : f32
    %210 = vector.broadcast %cst_66 : f32 to vector<14x1xf32>
    %211 = arith.divf %209, %210 : vector<14x1xf32>
    %212 = vector.broadcast %211 : vector<14x1xf32> to vector<14x256xf32>
    %213 = arith.subf %207, %212 : vector<14x256xf32>
    %214 = arith.mulf %213, %213 : vector<14x256xf32>
    %cst_67 = arith.constant dense<0.000000e+00> : vector<14xf32>
    %215 = vector.multi_reduction <add>, %214, %cst_67 [1] : vector<14x256xf32> to vector<14xf32>
    %216 = vector.shape_cast %215 : vector<14xf32> to vector<14x1xf32>
    %cst_68 = arith.constant 2.560000e+02 : f32
    %217 = vector.broadcast %cst_68 : f32 to vector<14x1xf32>
    %218 = arith.divf %216, %217 : vector<14x1xf32>
    %cst_69 = arith.constant 9.99999974E-6 : f32
    %219 = vector.broadcast %cst_69 : f32 to vector<14x1xf32>
    %220 = arith.addf %218, %219 : vector<14x1xf32>
    %221 = math.rsqrt %220 : vector<14x1xf32>
    %222 = vector.broadcast %221 : vector<14x1xf32> to vector<14x256xf32>
    %223 = arith.mulf %213, %222 : vector<14x256xf32>
    %c0_70 = arith.constant 0 : index
    %c0_71 = arith.constant 0 : index
    %224 = vector.load %arg11[%c0_70, %c0_71] : memref<1x256xf32, #tpu.memory_space<vmem>>, vector<1x256xf32>
    %225 = vector.broadcast %224 : vector<1x256xf32> to vector<14x256xf32>
    %226 = arith.mulf %223, %225 : vector<14x256xf32>
    %c0_72 = arith.constant 0 : index
    %c0_73 = arith.constant 0 : index
    %227 = vector.load %arg12[%c0_72, %c0_73] : memref<1x256xf32, #tpu.memory_space<vmem>>, vector<1x256xf32>
    %228 = vector.broadcast %227 : vector<1x256xf32> to vector<14x256xf32>
    %229 = arith.addf %226, %228 : vector<14x256xf32>
    %230 = arith.truncf %229 : vector<14x256xf32> to vector<14x256xbf16>
    %c0_74 = arith.constant 0 : index
    %c0_75 = arith.constant 0 : index
    %231 = vector.load %arg13[%c0_74, %c0_75] : memref<256x768xbf16, #tpu.memory_space<vmem>>, vector<256x768xbf16>
    %cst_76 = arith.constant dense<0.000000e+00> : vector<14x768xf32>
    %232 = tpu.matmul %230, %231, %cst_76 {dimension_numbers = #tpu.dot_dimension_numbers<[1], [0], [0], [1], [0, 0, 1, 1], [], []>} : vector<14x256xbf16>, vector<256x768xbf16>, vector<14x768xf32> -> vector<14x768xf32>
    %c0_77 = arith.constant 0 : index
    %c0_78 = arith.constant 0 : index
    %233 = vector.load %arg14[%c0_77, %c0_78] : memref<1x768xf32, #tpu.memory_space<vmem>>, vector<1x768xf32>
    %234 = vector.broadcast %233 : vector<1x768xf32> to vector<14x768xf32>
    %235 = arith.addf %232, %234 : vector<14x768xf32>
    %236 = vector.extract_strided_slice %235 {offsets = [0, 0], sizes = [14, 32], strides = [1, 1]} : vector<14x768xf32> to vector<14x32xf32>
    %237 = arith.truncf %236 : vector<14x32xf32> to vector<14x32xbf16>
    %238 = vector.extract_strided_slice %235 {offsets = [0, 256], sizes = [14, 32], strides = [1, 1]} : vector<14x768xf32> to vector<14x32xf32>
    %239 = arith.truncf %238 : vector<14x32xf32> to vector<14x32xbf16>
    %240 = vector.extract_strided_slice %235 {offsets = [0, 512], sizes = [14, 32], strides = [1, 1]} : vector<14x768xf32> to vector<14x32xf32>
    %241 = arith.truncf %240 : vector<14x32xf32> to vector<14x32xbf16>
    %cst_79 = arith.constant dense<0.000000e+00> : vector<14x14xf32>
    %242 = tpu.matmul %237, %239, %cst_79 {dimension_numbers = #tpu.dot_dimension_numbers<[1], [1], [0], [0], [0, 0, 1, 0], [], []>} : vector<14x32xbf16>, vector<14x32xbf16>, vector<14x14xf32> -> vector<14x14xf32>
    %cst_80 = arith.constant 0.176776692 : f32
    %243 = vector.broadcast %cst_80 : f32 to vector<14x14xf32>
    %244 = arith.mulf %242, %243 : vector<14x14xf32>
    %245 = arith.addf %244, %3 : vector<14x14xf32>
    %cst_81 = arith.constant dense<0xFF800000> : vector<14xf32>
    %246 = vector.multi_reduction <maximumf>, %245, %cst_81 [1] : vector<14x14xf32> to vector<14xf32>
    %247 = vector.shape_cast %246 : vector<14xf32> to vector<14x1xf32>
    %248 = vector.broadcast %247 : vector<14x1xf32> to vector<14x14xf32>
    %249 = arith.subf %245, %248 : vector<14x14xf32>
    %250 = math.exp %249 : vector<14x14xf32>
    %cst_82 = arith.constant dense<0.000000e+00> : vector<14xf32>
    %251 = vector.multi_reduction <add>, %250, %cst_82 [1] : vector<14x14xf32> to vector<14xf32>
    %252 = vector.shape_cast %251 : vector<14xf32> to vector<14x1xf32>
    %253 = tpu.reciprocal %252 {approx = true} : vector<14x1xf32> -> vector<14x1xf32>
    %254 = vector.broadcast %253 : vector<14x1xf32> to vector<14x14xf32>
    %255 = arith.mulf %250, %254 : vector<14x14xf32>
    %256 = arith.truncf %255 : vector<14x14xf32> to vector<14x14xbf16>
    %cst_83 = arith.constant dense<0.000000e+00> : vector<14x32xf32>
    %257 = tpu.matmul %256, %241, %cst_83 {dimension_numbers = #tpu.dot_dimension_numbers<[1], [0], [0], [1], [0, 0, 1, 1], [], []>} : vector<14x14xbf16>, vector<14x32xbf16>, vector<14x32xf32> -> vector<14x32xf32>
    %258 = vector.extract_strided_slice %235 {offsets = [0, 32], sizes = [14, 32], strides = [1, 1]} : vector<14x768xf32> to vector<14x32xf32>
    %259 = arith.truncf %258 : vector<14x32xf32> to vector<14x32xbf16>
    %260 = vector.extract_strided_slice %235 {offsets = [0, 288], sizes = [14, 32], strides = [1, 1]} : vector<14x768xf32> to vector<14x32xf32>
    %261 = arith.truncf %260 : vector<14x32xf32> to vector<14x32xbf16>
    %262 = vector.extract_strided_slice %235 {offsets = [0, 544], sizes = [14, 32], strides = [1, 1]} : vector<14x768xf32> to vector<14x32xf32>
    %263 = arith.truncf %262 : vector<14x32xf32> to vector<14x32xbf16>
    %cst_84 = arith.constant dense<0.000000e+00> : vector<14x14xf32>
    %264 = tpu.matmul %259, %261, %cst_84 {dimension_numbers = #tpu.dot_dimension_numbers<[1], [1], [0], [0], [0, 0, 1, 0], [], []>} : vector<14x32xbf16>, vector<14x32xbf16>, vector<14x14xf32> -> vector<14x14xf32>
    %cst_85 = arith.constant 0.176776692 : f32
    %265 = vector.broadcast %cst_85 : f32 to vector<14x14xf32>
    %266 = arith.mulf %264, %265 : vector<14x14xf32>
    %267 = arith.addf %266, %3 : vector<14x14xf32>
    %cst_86 = arith.constant dense<0xFF800000> : vector<14xf32>
    %268 = vector.multi_reduction <maximumf>, %267, %cst_86 [1] : vector<14x14xf32> to vector<14xf32>
    %269 = vector.shape_cast %268 : vector<14xf32> to vector<14x1xf32>
    %270 = vector.broadcast %269 : vector<14x1xf32> to vector<14x14xf32>
    %271 = arith.subf %267, %270 : vector<14x14xf32>
    %272 = math.exp %271 : vector<14x14xf32>
    %cst_87 = arith.constant dense<0.000000e+00> : vector<14xf32>
    %273 = vector.multi_reduction <add>, %272, %cst_87 [1] : vector<14x14xf32> to vector<14xf32>
    %274 = vector.shape_cast %273 : vector<14xf32> to vector<14x1xf32>
    %275 = tpu.reciprocal %274 {approx = true} : vector<14x1xf32> -> vector<14x1xf32>
    %276 = vector.broadcast %275 : vector<14x1xf32> to vector<14x14xf32>
    %277 = arith.mulf %272, %276 : vector<14x14xf32>
    %278 = arith.truncf %277 : vector<14x14xf32> to vector<14x14xbf16>
    %cst_88 = arith.constant dense<0.000000e+00> : vector<14x32xf32>
    %279 = tpu.matmul %278, %263, %cst_88 {dimension_numbers = #tpu.dot_dimension_numbers<[1], [0], [0], [1], [0, 0, 1, 1], [], []>} : vector<14x14xbf16>, vector<14x32xbf16>, vector<14x32xf32> -> vector<14x32xf32>
    %280 = vector.extract_strided_slice %235 {offsets = [0, 64], sizes = [14, 32], strides = [1, 1]} : vector<14x768xf32> to vector<14x32xf32>
    %281 = arith.truncf %280 : vector<14x32xf32> to vector<14x32xbf16>
    %282 = vector.extract_strided_slice %235 {offsets = [0, 320], sizes = [14, 32], strides = [1, 1]} : vector<14x768xf32> to vector<14x32xf32>
    %283 = arith.truncf %282 : vector<14x32xf32> to vector<14x32xbf16>
    %284 = vector.extract_strided_slice %235 {offsets = [0, 576], sizes = [14, 32], strides = [1, 1]} : vector<14x768xf32> to vector<14x32xf32>
    %285 = arith.truncf %284 : vector<14x32xf32> to vector<14x32xbf16>
    %cst_89 = arith.constant dense<0.000000e+00> : vector<14x14xf32>
    %286 = tpu.matmul %281, %283, %cst_89 {dimension_numbers = #tpu.dot_dimension_numbers<[1], [1], [0], [0], [0, 0, 1, 0], [], []>} : vector<14x32xbf16>, vector<14x32xbf16>, vector<14x14xf32> -> vector<14x14xf32>
    %cst_90 = arith.constant 0.176776692 : f32
    %287 = vector.broadcast %cst_90 : f32 to vector<14x14xf32>
    %288 = arith.mulf %286, %287 : vector<14x14xf32>
    %289 = arith.addf %288, %3 : vector<14x14xf32>
    %cst_91 = arith.constant dense<0xFF800000> : vector<14xf32>
    %290 = vector.multi_reduction <maximumf>, %289, %cst_91 [1] : vector<14x14xf32> to vector<14xf32>
    %291 = vector.shape_cast %290 : vector<14xf32> to vector<14x1xf32>
    %292 = vector.broadcast %291 : vector<14x1xf32> to vector<14x14xf32>
    %293 = arith.subf %289, %292 : vector<14x14xf32>
    %294 = math.exp %293 : vector<14x14xf32>
    %cst_92 = arith.constant dense<0.000000e+00> : vector<14xf32>
    %295 = vector.multi_reduction <add>, %294, %cst_92 [1] : vector<14x14xf32> to vector<14xf32>
    %296 = vector.shape_cast %295 : vector<14xf32> to vector<14x1xf32>
    %297 = tpu.reciprocal %296 {approx = true} : vector<14x1xf32> -> vector<14x1xf32>
    %298 = vector.broadcast %297 : vector<14x1xf32> to vector<14x14xf32>
    %299 = arith.mulf %294, %298 : vector<14x14xf32>
    %300 = arith.truncf %299 : vector<14x14xf32> to vector<14x14xbf16>
    %cst_93 = arith.constant dense<0.000000e+00> : vector<14x32xf32>
    %301 = tpu.matmul %300, %285, %cst_93 {dimension_numbers = #tpu.dot_dimension_numbers<[1], [0], [0], [1], [0, 0, 1, 1], [], []>} : vector<14x14xbf16>, vector<14x32xbf16>, vector<14x32xf32> -> vector<14x32xf32>
    %302 = vector.extract_strided_slice %235 {offsets = [0, 96], sizes = [14, 32], strides = [1, 1]} : vector<14x768xf32> to vector<14x32xf32>
    %303 = arith.truncf %302 : vector<14x32xf32> to vector<14x32xbf16>
    %304 = vector.extract_strided_slice %235 {offsets = [0, 352], sizes = [14, 32], strides = [1, 1]} : vector<14x768xf32> to vector<14x32xf32>
    %305 = arith.truncf %304 : vector<14x32xf32> to vector<14x32xbf16>
    %306 = vector.extract_strided_slice %235 {offsets = [0, 608], sizes = [14, 32], strides = [1, 1]} : vector<14x768xf32> to vector<14x32xf32>
    %307 = arith.truncf %306 : vector<14x32xf32> to vector<14x32xbf16>
    %cst_94 = arith.constant dense<0.000000e+00> : vector<14x14xf32>
    %308 = tpu.matmul %303, %305, %cst_94 {dimension_numbers = #tpu.dot_dimension_numbers<[1], [1], [0], [0], [0, 0, 1, 0], [], []>} : vector<14x32xbf16>, vector<14x32xbf16>, vector<14x14xf32> -> vector<14x14xf32>
    %cst_95 = arith.constant 0.176776692 : f32
    %309 = vector.broadcast %cst_95 : f32 to vector<14x14xf32>
    %310 = arith.mulf %308, %309 : vector<14x14xf32>
    %311 = arith.addf %310, %3 : vector<14x14xf32>
    %cst_96 = arith.constant dense<0xFF800000> : vector<14xf32>
    %312 = vector.multi_reduction <maximumf>, %311, %cst_96 [1] : vector<14x14xf32> to vector<14xf32>
    %313 = vector.shape_cast %312 : vector<14xf32> to vector<14x1xf32>
    %314 = vector.broadcast %313 : vector<14x1xf32> to vector<14x14xf32>
    %315 = arith.subf %311, %314 : vector<14x14xf32>
    %316 = math.exp %315 : vector<14x14xf32>
    %cst_97 = arith.constant dense<0.000000e+00> : vector<14xf32>
    %317 = vector.multi_reduction <add>, %316, %cst_97 [1] : vector<14x14xf32> to vector<14xf32>
    %318 = vector.shape_cast %317 : vector<14xf32> to vector<14x1xf32>
    %319 = tpu.reciprocal %318 {approx = true} : vector<14x1xf32> -> vector<14x1xf32>
    %320 = vector.broadcast %319 : vector<14x1xf32> to vector<14x14xf32>
    %321 = arith.mulf %316, %320 : vector<14x14xf32>
    %322 = arith.truncf %321 : vector<14x14xf32> to vector<14x14xbf16>
    %cst_98 = arith.constant dense<0.000000e+00> : vector<14x32xf32>
    %323 = tpu.matmul %322, %307, %cst_98 {dimension_numbers = #tpu.dot_dimension_numbers<[1], [0], [0], [1], [0, 0, 1, 1], [], []>} : vector<14x14xbf16>, vector<14x32xbf16>, vector<14x32xf32> -> vector<14x32xf32>
    %324 = vector.extract_strided_slice %235 {offsets = [0, 128], sizes = [14, 32], strides = [1, 1]} : vector<14x768xf32> to vector<14x32xf32>
    %325 = arith.truncf %324 : vector<14x32xf32> to vector<14x32xbf16>
    %326 = vector.extract_strided_slice %235 {offsets = [0, 384], sizes = [14, 32], strides = [1, 1]} : vector<14x768xf32> to vector<14x32xf32>
    %327 = arith.truncf %326 : vector<14x32xf32> to vector<14x32xbf16>
    %328 = vector.extract_strided_slice %235 {offsets = [0, 640], sizes = [14, 32], strides = [1, 1]} : vector<14x768xf32> to vector<14x32xf32>
    %329 = arith.truncf %328 : vector<14x32xf32> to vector<14x32xbf16>
    %cst_99 = arith.constant dense<0.000000e+00> : vector<14x14xf32>
    %330 = tpu.matmul %325, %327, %cst_99 {dimension_numbers = #tpu.dot_dimension_numbers<[1], [1], [0], [0], [0, 0, 1, 0], [], []>} : vector<14x32xbf16>, vector<14x32xbf16>, vector<14x14xf32> -> vector<14x14xf32>
    %cst_100 = arith.constant 0.176776692 : f32
    %331 = vector.broadcast %cst_100 : f32 to vector<14x14xf32>
    %332 = arith.mulf %330, %331 : vector<14x14xf32>
    %333 = arith.addf %332, %3 : vector<14x14xf32>
    %cst_101 = arith.constant dense<0xFF800000> : vector<14xf32>
    %334 = vector.multi_reduction <maximumf>, %333, %cst_101 [1] : vector<14x14xf32> to vector<14xf32>
    %335 = vector.shape_cast %334 : vector<14xf32> to vector<14x1xf32>
    %336 = vector.broadcast %335 : vector<14x1xf32> to vector<14x14xf32>
    %337 = arith.subf %333, %336 : vector<14x14xf32>
    %338 = math.exp %337 : vector<14x14xf32>
    %cst_102 = arith.constant dense<0.000000e+00> : vector<14xf32>
    %339 = vector.multi_reduction <add>, %338, %cst_102 [1] : vector<14x14xf32> to vector<14xf32>
    %340 = vector.shape_cast %339 : vector<14xf32> to vector<14x1xf32>
    %341 = tpu.reciprocal %340 {approx = true} : vector<14x1xf32> -> vector<14x1xf32>
    %342 = vector.broadcast %341 : vector<14x1xf32> to vector<14x14xf32>
    %343 = arith.mulf %338, %342 : vector<14x14xf32>
    %344 = arith.truncf %343 : vector<14x14xf32> to vector<14x14xbf16>
    %cst_103 = arith.constant dense<0.000000e+00> : vector<14x32xf32>
    %345 = tpu.matmul %344, %329, %cst_103 {dimension_numbers = #tpu.dot_dimension_numbers<[1], [0], [0], [1], [0, 0, 1, 1], [], []>} : vector<14x14xbf16>, vector<14x32xbf16>, vector<14x32xf32> -> vector<14x32xf32>
    %346 = vector.extract_strided_slice %235 {offsets = [0, 160], sizes = [14, 32], strides = [1, 1]} : vector<14x768xf32> to vector<14x32xf32>
    %347 = arith.truncf %346 : vector<14x32xf32> to vector<14x32xbf16>
    %348 = vector.extract_strided_slice %235 {offsets = [0, 416], sizes = [14, 32], strides = [1, 1]} : vector<14x768xf32> to vector<14x32xf32>
    %349 = arith.truncf %348 : vector<14x32xf32> to vector<14x32xbf16>
    %350 = vector.extract_strided_slice %235 {offsets = [0, 672], sizes = [14, 32], strides = [1, 1]} : vector<14x768xf32> to vector<14x32xf32>
    %351 = arith.truncf %350 : vector<14x32xf32> to vector<14x32xbf16>
    %cst_104 = arith.constant dense<0.000000e+00> : vector<14x14xf32>
    %352 = tpu.matmul %347, %349, %cst_104 {dimension_numbers = #tpu.dot_dimension_numbers<[1], [1], [0], [0], [0, 0, 1, 0], [], []>} : vector<14x32xbf16>, vector<14x32xbf16>, vector<14x14xf32> -> vector<14x14xf32>
    %cst_105 = arith.constant 0.176776692 : f32
    %353 = vector.broadcast %cst_105 : f32 to vector<14x14xf32>
    %354 = arith.mulf %352, %353 : vector<14x14xf32>
    %355 = arith.addf %354, %3 : vector<14x14xf32>
    %cst_106 = arith.constant dense<0xFF800000> : vector<14xf32>
    %356 = vector.multi_reduction <maximumf>, %355, %cst_106 [1] : vector<14x14xf32> to vector<14xf32>
    %357 = vector.shape_cast %356 : vector<14xf32> to vector<14x1xf32>
    %358 = vector.broadcast %357 : vector<14x1xf32> to vector<14x14xf32>
    %359 = arith.subf %355, %358 : vector<14x14xf32>
    %360 = math.exp %359 : vector<14x14xf32>
    %cst_107 = arith.constant dense<0.000000e+00> : vector<14xf32>
    %361 = vector.multi_reduction <add>, %360, %cst_107 [1] : vector<14x14xf32> to vector<14xf32>
    %362 = vector.shape_cast %361 : vector<14xf32> to vector<14x1xf32>
    %363 = tpu.reciprocal %362 {approx = true} : vector<14x1xf32> -> vector<14x1xf32>
    %364 = vector.broadcast %363 : vector<14x1xf32> to vector<14x14xf32>
    %365 = arith.mulf %360, %364 : vector<14x14xf32>
    %366 = arith.truncf %365 : vector<14x14xf32> to vector<14x14xbf16>
    %cst_108 = arith.constant dense<0.000000e+00> : vector<14x32xf32>
    %367 = tpu.matmul %366, %351, %cst_108 {dimension_numbers = #tpu.dot_dimension_numbers<[1], [0], [0], [1], [0, 0, 1, 1], [], []>} : vector<14x14xbf16>, vector<14x32xbf16>, vector<14x32xf32> -> vector<14x32xf32>
    %368 = vector.extract_strided_slice %235 {offsets = [0, 192], sizes = [14, 32], strides = [1, 1]} : vector<14x768xf32> to vector<14x32xf32>
    %369 = arith.truncf %368 : vector<14x32xf32> to vector<14x32xbf16>
    %370 = vector.extract_strided_slice %235 {offsets = [0, 448], sizes = [14, 32], strides = [1, 1]} : vector<14x768xf32> to vector<14x32xf32>
    %371 = arith.truncf %370 : vector<14x32xf32> to vector<14x32xbf16>
    %372 = vector.extract_strided_slice %235 {offsets = [0, 704], sizes = [14, 32], strides = [1, 1]} : vector<14x768xf32> to vector<14x32xf32>
    %373 = arith.truncf %372 : vector<14x32xf32> to vector<14x32xbf16>
    %cst_109 = arith.constant dense<0.000000e+00> : vector<14x14xf32>
    %374 = tpu.matmul %369, %371, %cst_109 {dimension_numbers = #tpu.dot_dimension_numbers<[1], [1], [0], [0], [0, 0, 1, 0], [], []>} : vector<14x32xbf16>, vector<14x32xbf16>, vector<14x14xf32> -> vector<14x14xf32>
    %cst_110 = arith.constant 0.176776692 : f32
    %375 = vector.broadcast %cst_110 : f32 to vector<14x14xf32>
    %376 = arith.mulf %374, %375 : vector<14x14xf32>
    %377 = arith.addf %376, %3 : vector<14x14xf32>
    %cst_111 = arith.constant dense<0xFF800000> : vector<14xf32>
    %378 = vector.multi_reduction <maximumf>, %377, %cst_111 [1] : vector<14x14xf32> to vector<14xf32>
    %379 = vector.shape_cast %378 : vector<14xf32> to vector<14x1xf32>
    %380 = vector.broadcast %379 : vector<14x1xf32> to vector<14x14xf32>
    %381 = arith.subf %377, %380 : vector<14x14xf32>
    %382 = math.exp %381 : vector<14x14xf32>
    %cst_112 = arith.constant dense<0.000000e+00> : vector<14xf32>
    %383 = vector.multi_reduction <add>, %382, %cst_112 [1] : vector<14x14xf32> to vector<14xf32>
    %384 = vector.shape_cast %383 : vector<14xf32> to vector<14x1xf32>
    %385 = tpu.reciprocal %384 {approx = true} : vector<14x1xf32> -> vector<14x1xf32>
    %386 = vector.broadcast %385 : vector<14x1xf32> to vector<14x14xf32>
    %387 = arith.mulf %382, %386 : vector<14x14xf32>
    %388 = arith.truncf %387 : vector<14x14xf32> to vector<14x14xbf16>
    %cst_113 = arith.constant dense<0.000000e+00> : vector<14x32xf32>
    %389 = tpu.matmul %388, %373, %cst_113 {dimension_numbers = #tpu.dot_dimension_numbers<[1], [0], [0], [1], [0, 0, 1, 1], [], []>} : vector<14x14xbf16>, vector<14x32xbf16>, vector<14x32xf32> -> vector<14x32xf32>
    %390 = vector.extract_strided_slice %235 {offsets = [0, 224], sizes = [14, 32], strides = [1, 1]} : vector<14x768xf32> to vector<14x32xf32>
    %391 = arith.truncf %390 : vector<14x32xf32> to vector<14x32xbf16>
    %392 = vector.extract_strided_slice %235 {offsets = [0, 480], sizes = [14, 32], strides = [1, 1]} : vector<14x768xf32> to vector<14x32xf32>
    %393 = arith.truncf %392 : vector<14x32xf32> to vector<14x32xbf16>
    %394 = vector.extract_strided_slice %235 {offsets = [0, 736], sizes = [14, 32], strides = [1, 1]} : vector<14x768xf32> to vector<14x32xf32>
    %395 = arith.truncf %394 : vector<14x32xf32> to vector<14x32xbf16>
    %cst_114 = arith.constant dense<0.000000e+00> : vector<14x14xf32>
    %396 = tpu.matmul %391, %393, %cst_114 {dimension_numbers = #tpu.dot_dimension_numbers<[1], [1], [0], [0], [0, 0, 1, 0], [], []>} : vector<14x32xbf16>, vector<14x32xbf16>, vector<14x14xf32> -> vector<14x14xf32>
    %cst_115 = arith.constant 0.176776692 : f32
    %397 = vector.broadcast %cst_115 : f32 to vector<14x14xf32>
    %398 = arith.mulf %396, %397 : vector<14x14xf32>
    %399 = arith.addf %398, %3 : vector<14x14xf32>
    %cst_116 = arith.constant dense<0xFF800000> : vector<14xf32>
    %400 = vector.multi_reduction <maximumf>, %399, %cst_116 [1] : vector<14x14xf32> to vector<14xf32>
    %401 = vector.shape_cast %400 : vector<14xf32> to vector<14x1xf32>
    %402 = vector.broadcast %401 : vector<14x1xf32> to vector<14x14xf32>
    %403 = arith.subf %399, %402 : vector<14x14xf32>
    %404 = math.exp %403 : vector<14x14xf32>
    %cst_117 = arith.constant dense<0.000000e+00> : vector<14xf32>
    %405 = vector.multi_reduction <add>, %404, %cst_117 [1] : vector<14x14xf32> to vector<14xf32>
    %406 = vector.shape_cast %405 : vector<14xf32> to vector<14x1xf32>
    %407 = tpu.reciprocal %406 {approx = true} : vector<14x1xf32> -> vector<14x1xf32>
    %408 = vector.broadcast %407 : vector<14x1xf32> to vector<14x14xf32>
    %409 = arith.mulf %404, %408 : vector<14x14xf32>
    %410 = arith.truncf %409 : vector<14x14xf32> to vector<14x14xbf16>
    %cst_118 = arith.constant dense<0.000000e+00> : vector<14x32xf32>
    %411 = tpu.matmul %410, %395, %cst_118 {dimension_numbers = #tpu.dot_dimension_numbers<[1], [0], [0], [1], [0, 0, 1, 1], [], []>} : vector<14x14xbf16>, vector<14x32xbf16>, vector<14x32xf32> -> vector<14x32xf32>
    %412 = tpu.concatenate %257, %279, %301, %323, %345, %367, %389, %411 in 1 : vector<14x32xf32>, vector<14x32xf32>, vector<14x32xf32>, vector<14x32xf32>, vector<14x32xf32>, vector<14x32xf32>, vector<14x32xf32>, vector<14x32xf32> -> vector<14x256xf32>
    %413 = arith.truncf %412 : vector<14x256xf32> to vector<14x256xbf16>
    %c0_119 = arith.constant 0 : index
    %c0_120 = arith.constant 0 : index
    %414 = vector.load %arg15[%c0_119, %c0_120] : memref<256x256xbf16, #tpu.memory_space<vmem>>, vector<256x256xbf16>
    %cst_121 = arith.constant dense<0.000000e+00> : vector<14x256xf32>
    %415 = tpu.matmul %413, %414, %cst_121 {dimension_numbers = #tpu.dot_dimension_numbers<[1], [0], [0], [1], [0, 0, 1, 1], [], []>} : vector<14x256xbf16>, vector<256x256xbf16>, vector<14x256xf32> -> vector<14x256xf32>
    %c0_122 = arith.constant 0 : index
    %c0_123 = arith.constant 0 : index
    %416 = vector.load %arg16[%c0_122, %c0_123] : memref<1x256xf32, #tpu.memory_space<vmem>>, vector<1x256xf32>
    %417 = vector.broadcast %416 : vector<1x256xf32> to vector<14x256xf32>
    %418 = arith.addf %415, %417 : vector<14x256xf32>
    %419 = arith.truncf %418 : vector<14x256xf32> to vector<14x256xbf16>
    %c0_124 = arith.constant 0 : index
    %c0_125 = arith.constant 0 : index
    %420 = vector.load %arg17[%c0_124, %c0_125] : memref<256x512xbf16, #tpu.memory_space<vmem>>, vector<256x512xbf16>
    %cst_126 = arith.constant dense<0.000000e+00> : vector<14x512xf32>
    %421 = tpu.matmul %419, %420, %cst_126 {dimension_numbers = #tpu.dot_dimension_numbers<[1], [0], [0], [1], [0, 0, 1, 1], [], []>} : vector<14x256xbf16>, vector<256x512xbf16>, vector<14x512xf32> -> vector<14x512xf32>
    %c0_127 = arith.constant 0 : index
    %c0_128 = arith.constant 0 : index
    %422 = vector.load %arg18[%c0_127, %c0_128] : memref<1x512xf32, #tpu.memory_space<vmem>>, vector<1x512xf32>
    %423 = vector.broadcast %422 : vector<1x512xf32> to vector<14x512xf32>
    %424 = arith.addf %421, %423 : vector<14x512xf32>
    %cst_129 = arith.constant 0.000000e+00 : f32
    %425 = vector.broadcast %cst_129 : f32 to vector<14x512xf32>
    %426 = arith.maximumf %424, %425 : vector<14x512xf32>
    %427 = arith.truncf %426 : vector<14x512xf32> to vector<14x512xbf16>
    %c0_130 = arith.constant 0 : index
    %c0_131 = arith.constant 0 : index
    %428 = vector.load %arg19[%c0_130, %c0_131] : memref<512x256xbf16, #tpu.memory_space<vmem>>, vector<512x256xbf16>
    %cst_132 = arith.constant dense<0.000000e+00> : vector<14x256xf32>
    %429 = tpu.matmul %427, %428, %cst_132 {dimension_numbers = #tpu.dot_dimension_numbers<[1], [0], [0], [1], [0, 0, 1, 1], [], []>} : vector<14x512xbf16>, vector<512x256xbf16>, vector<14x256xf32> -> vector<14x256xf32>
    %c0_133 = arith.constant 0 : index
    %c0_134 = arith.constant 0 : index
    %430 = vector.load %arg20[%c0_133, %c0_134] : memref<1x256xf32, #tpu.memory_space<vmem>>, vector<1x256xf32>
    %431 = vector.broadcast %430 : vector<1x256xf32> to vector<14x256xf32>
    %432 = arith.addf %429, %431 : vector<14x256xf32>
    %433 = arith.addf %432, %229 : vector<14x256xf32>
    %cst_135 = arith.constant dense<0.000000e+00> : vector<14xf32>
    %434 = vector.multi_reduction <add>, %433, %cst_135 [1] : vector<14x256xf32> to vector<14xf32>
    %435 = vector.shape_cast %434 : vector<14xf32> to vector<14x1xf32>
    %cst_136 = arith.constant 2.560000e+02 : f32
    %436 = vector.broadcast %cst_136 : f32 to vector<14x1xf32>
    %437 = arith.divf %435, %436 : vector<14x1xf32>
    %438 = vector.broadcast %437 : vector<14x1xf32> to vector<14x256xf32>
    %439 = arith.subf %433, %438 : vector<14x256xf32>
    %440 = arith.mulf %439, %439 : vector<14x256xf32>
    %cst_137 = arith.constant dense<0.000000e+00> : vector<14xf32>
    %441 = vector.multi_reduction <add>, %440, %cst_137 [1] : vector<14x256xf32> to vector<14xf32>
    %442 = vector.shape_cast %441 : vector<14xf32> to vector<14x1xf32>
    %cst_138 = arith.constant 2.560000e+02 : f32
    %443 = vector.broadcast %cst_138 : f32 to vector<14x1xf32>
    %444 = arith.divf %442, %443 : vector<14x1xf32>
    %cst_139 = arith.constant 9.99999974E-6 : f32
    %445 = vector.broadcast %cst_139 : f32 to vector<14x1xf32>
    %446 = arith.addf %444, %445 : vector<14x1xf32>
    %447 = math.rsqrt %446 : vector<14x1xf32>
    %448 = vector.broadcast %447 : vector<14x1xf32> to vector<14x256xf32>
    %449 = arith.mulf %439, %448 : vector<14x256xf32>
    %c0_140 = arith.constant 0 : index
    %c0_141 = arith.constant 0 : index
    %450 = vector.load %arg21[%c0_140, %c0_141] : memref<1x256xf32, #tpu.memory_space<vmem>>, vector<1x256xf32>
    %451 = vector.broadcast %450 : vector<1x256xf32> to vector<14x256xf32>
    %452 = arith.mulf %449, %451 : vector<14x256xf32>
    %c0_142 = arith.constant 0 : index
    %c0_143 = arith.constant 0 : index
    %453 = vector.load %arg22[%c0_142, %c0_143] : memref<1x256xf32, #tpu.memory_space<vmem>>, vector<1x256xf32>
    %454 = vector.broadcast %453 : vector<1x256xf32> to vector<14x256xf32>
    %455 = arith.addf %452, %454 : vector<14x256xf32>
    %cst_144 = arith.constant 0.000000e+00 : f32
    %456 = vector.broadcast %cst_144 : f32 to vector<14x256xf32>
    %457 = arith.maximumf %455, %456 : vector<14x256xf32>
    %c0_145 = arith.constant 0 : index
    %c0_146 = arith.constant 0 : index
    %458 = vector.load %arg23[%c0_145, %c0_146] : memref<14x256xf32, #tpu.memory_space<vmem>>, vector<14x256xf32>
    tpu.vector_store %arg23[%c0_145, %c0_146], %457 {strides = array<i32>} : memref<14x256xf32, #tpu.memory_space<vmem>>, vector<14x256xf32>,
    return
  }
}

</mosaic_0001>

<bundles_post_ra>
// kernel: ne.8
= control target key start
LH: loop header
LB: loop body
LE: loop exit
PB: predicated region body
PF: predicated region fallthrough
CT: control target
= control target key end

     0   :  { %vm7_vm0 = vcmask 56320   ;;  %vm13_vm1 = vcmask 113720   ;;  %s39_s0 = inlined_call_operand.vmem [shape: s32[2,7], index: 0, kind: input, shape index: {}]   ;;  %s40_s1 = inlined_call_operand.vmem [shape: s32[14], index: 1, kind: output, shape index: {}]  }
   0x1   :  { %v4_v0 = vld [vmem:[%s39_s0] sm:$0x3]  ;;  %s22_s0 = smov 7  }
   0x2   :  { %5 = vst [vmem:[#allocation1] sm:$0x3] %v4_v0 }
   0x9   :  { %v10_v1 = vld [vmem:[#allocation1 + $0x1] sm:$0x1]   ;;  %v6_v2 = vld [vmem:[#allocation1] sm:$0x1]  }
   0xa   :  { %11 = vrot.lane.b32.xlu0 %v10_v1, %s22_s0  ;;  %8 = vst.msk [vmem:[#allocation0] sm:$0x1] %vm7_vm0, %v6_v2  }
  0x7c   :  { %v12_v3 = vpop.permute.xlu0 %11  }
  0x7d   :  { %14 = vst.msk [vmem:[#allocation0] sm:$0x1] %vm13_vm1, %v12_v3  }
  0x84   :  { %v18_v4 = vld [vmem:[#allocation0] sm:$0x1] }
  0x85   :  { %20 = vst [vmem:[%s40_s1] sm:$0x1] %v18_v4 }

</bundles_post_ra>
